<compile_context>
chip_gen: v6e
topology: v6e:2x2x1
jax: 0.10.0
libtpu: 0.0.40
codegen_flags: <defaults>
</compile_context>

<pallas_src>
import functools
import math

import jax
import jax.numpy as jnp
from jax.experimental import pallas as pl
from jax.experimental.pallas import tpu as pltpu


def _attention_kernel(*refs, scale, g, dh, cross):
    """One (batch, head-group) pair per grid step."""
    if cross:
        (x_ref, kv_ref, wq_ref, wk_ref, wv_ref, b_ref, mask_ref, out_ref) = refs
    else:
        (x_ref, wq_ref, wk_ref, wv_ref, b_ref, mask_ref, out_ref) = refs

    G = g * dh
    hg = pl.program_id(1)
    row = pl.multiple_of(hg * G, G)   # row offset of this head group in the [H, H] weights

    # bf16 operands for the MXU, f32 accumulation.
    x = x_ref[0].astype(jnp.bfloat16)                       # (S_q, H)
    xkv = kv_ref[0].astype(jnp.bfloat16) if cross else x    # (S_kv, H)

    ball = b_ref[...].astype(jnp.float32)                   # (3, G): [bq; bk; bv]
    bq, bk, bv = ball[0:1], ball[1:2], ball[2:3]            # each (1, G)

    def proj(xin, w_ref, b):
        # PyTorch Linear weight is [out, in]; slice this group's output rows and
        # contract the `in` axes directly (x @ W_g^T) — no wrapper transpose.
        w = w_ref[pl.ds(row, G), :].astype(jnp.bfloat16)    # (G, H)
        y = jax.lax.dot_general(xin, w, (((1,), (1,)), ((), ())),
                                preferred_element_type=jnp.float32)   # (S, G)
        return y + b

    # Scale folded into q (cheaper than scaling the (S_q, S_kv) scores tile).
    q = (proj(x, wq_ref, bq) * scale).astype(jnp.bfloat16)   # (S_q, G)
    k = proj(xkv, wk_ref, bk).astype(jnp.bfloat16)           # (S_kv, G)
    v = proj(xkv, wv_ref, bv).astype(jnp.bfloat16)           # (S_kv, G)

    mask = mask_ref[0]                                       # (1, S_kv) additive mask

    ctxs = []
    for h in range(g):                                       # static unroll over grouped heads
        lo = h * dh
        qh = q[:, lo:lo + dh]
        kh = k[:, lo:lo + dh]
        vh = v[:, lo:lo + dh]
        s = jax.lax.dot_general(qh, kh, (((1,), (1,)), ((), ())),
                                preferred_element_type=jnp.float32)   # (S_q, S_kv)
        s = s + mask
        m = jnp.max(s, axis=-1, keepdims=True)
        e = jnp.exp(s - m)
        r = pl.reciprocal(jnp.sum(e, axis=-1, keepdims=True), approx=True)
        p = (e * r).astype(jnp.bfloat16)
        # TODO(synk): attention-prob dropout (training), head_mask, AdaptiveSpan
        # not implemented; nn.Dropout is identity in eval mode.
        ctxs.append(jnp.dot(p, vh, preferred_element_type=jnp.float32))  # (S_q, dh)

    ctx = jnp.concatenate(ctxs, axis=-1) if g > 1 else ctxs[0]           # (S_q, G) head-merged
    out_ref[0] = ctx.astype(out_ref.dtype)                               # single lane-dense store


def _pick_head_group(nh, dh, target_lanes=256):
    """Largest g dividing nh with g*dh a multiple of 128 and <= ~target lanes."""
    best = None
    for g in range(1, nh + 1):
        if nh % g:
            continue
        G = g * dh
        if G % 128 == 0 and G <= max(target_lanes, 128):
            best = g
    return best if best is not None else nh   # fallback: one group spanning full H


def bert_self_attention(hidden_states, wq, bq, wk, bk, wv, bv,
                        attention_mask=None, encoder_hidden_states=None,
                        *, num_attention_heads):
    """Matches BertSelfAttention.forward (eval mode, output_attentions=False)."""
    B, S, H = hidden_states.shape
    nh = num_attention_heads
    assert H % nh == 0, "hidden_size must be divisible by num_attention_heads"
    dh = H // nh
    cross = encoder_hidden_states is not None
    kv = encoder_hidden_states if cross else hidden_states
    S_kv = kv.shape[1]
    scale = 1.0 / math.sqrt(dh)

    g = _pick_head_group(nh, dh)
    G = g * dh
    groups = nh // g

    # Tiny bias stack; weights stay in the PyTorch [out, in] layout (no re-layout).
    b_all = jnp.stack([bq, bk, bv], axis=0).astype(jnp.float32)          # (3, H)

    if attention_mask is None:
        mask = jnp.zeros((B, 1, S_kv), jnp.float32)
    else:
        # Additive ("extended") mask, e.g. 0 for keep / -10000 for masked.
        mask = jnp.asarray(attention_mask, jnp.float32).reshape(B, 1, S_kv)

    in_specs = [pl.BlockSpec((1, S, H), lambda b, hg: (b, 0, 0))]        # hidden (queries; and K/V if self-attn)
    inputs = [hidden_states]
    if cross:
        in_specs.append(pl.BlockSpec((1, S_kv, H), lambda b, hg: (b, 0, 0)))
        inputs.append(encoder_hidden_states)
    in_specs += [
        pl.BlockSpec((H, H), lambda b, hg: (0, 0)),        # W_q: grid-invariant, fetched once
        pl.BlockSpec((H, H), lambda b, hg: (0, 0)),        # W_k
        pl.BlockSpec((H, H), lambda b, hg: (0, 0)),        # W_v
        pl.BlockSpec((3, G), lambda b, hg: (0, hg)),       # [bq; bk; bv] head-group slice
        pl.BlockSpec((1, 1, S_kv), lambda b, hg: (b, 0, 0)),
    ]
    inputs += [wq, wk, wv, b_all, mask]

    kernel = functools.partial(_attention_kernel, scale=scale, g=g, dh=dh, cross=cross)

    out = pl.pallas_call(
        kernel,
        out_shape=jax.ShapeDtypeStruct((B, S, H), hidden_states.dtype),  # head-merged layout
        grid=(B, groups),
        in_specs=in_specs,
        out_specs=pl.BlockSpec((1, S, G), lambda b, hg: (b, 0, hg)),
        compiler_params=pltpu.CompilerParams(
            dimension_semantics=("parallel", "parallel")),
    )(*inputs)
    return out                                                           # (B, S, H), no wrapper transpose


if __name__ == "__main__":
    # Small config consistent with BertSelfAttention.__init__
    B, S, H, NH = 2, 8, 32, 4        # batch, seq_len, hidden_size, num_attention_heads
    DH = H // NH

    key = jax.random.PRNGKey(0)
    ks = jax.random.split(key, 7)

    hidden = jax.random.normal(ks[0], (B, S, H), jnp.float32)
    # nn.Linear parameters, [out, in] layout like PyTorch.
    wq = 0.05 * jax.random.normal(ks[1], (H, H), jnp.float32)
    wk = 0.05 * jax.random.normal(ks[2], (H, H), jnp.float32)
    wv = 0.05 * jax.random.normal(ks[3], (H, H), jnp.float32)
    bq = 0.05 * jax.random.normal(ks[4], (H,), jnp.float32)
    bk = 0.05 * jax.random.normal(ks[5], (H,), jnp.float32)
    bv = 0.05 * jax.random.normal(ks[6], (H,), jnp.float32)

    # Additive attention mask (0 = keep, -10000 = masked): mask the last two
    # key positions of the second sequence.
    keep = jnp.ones((B, S), jnp.float32).at[1, -2:].set(0.0)
    attn_mask = (1.0 - keep) * -10000.0

    ctx = bert_self_attention(hidden, wq, bq, wk, bk, wv, bv,
                              attention_mask=attn_mask,
                              num_attention_heads=NH)
    ctx = jax.block_until_ready(ctx)

    # Pure-JAX f32 reference mirroring the PyTorch forward (eval mode).
    q = hidden @ wq.T + bq
    k = hidden @ wk.T + bk
    v = hidden @ wv.T + bv

    def split_heads(x):
        return x.reshape(B, S, NH, DH).transpose(0, 2, 1, 3)

    qh, kh, vh = split_heads(q), split_heads(k), split_heads(v)
    scores = jnp.einsum('bhqd,bhkd->bhqk', qh, kh) / math.sqrt(DH)
    scores = scores + attn_mask[:, None, None, :]
    probs = jax.nn.softmax(scores, axis=-1)
    ref = jnp.einsum('bhqk,bhkd->bhqd', probs, vh)
    ref = ref.transpose(0, 2, 1, 3).reshape(B, S, H)

    assert ctx.shape == (B, S, H)
    # bf16 MXU operands + approx reciprocal -> ~1e-2-level relative error vs f32 ref.
    assert jnp.allclose(ctx, ref, atol=2e-2, rtol=2e-2), "mismatch vs reference"
    print("KERNEL_OK")
</pallas_src>

<mosaic_0001>
module attributes {stable_mosaic.version = 11 : i64} {
  func.func @_attention_kernel(%arg0: i32, %arg1: i32, %arg2: memref<1x8x32xf32, #tpu.memory_space<vmem>>, %arg3: memref<32x32xf32, #tpu.memory_space<vmem>>, %arg4: memref<32x32xf32, #tpu.memory_space<vmem>>, %arg5: memref<32x32xf32, #tpu.memory_space<vmem>>, %arg6: memref<3x32xf32, #tpu.memory_space<vmem>>, %arg7: memref<1x1x8xf32, #tpu.memory_space<vmem>>, %arg8: memref<1x8x32xf32, #tpu.memory_space<vmem>>) attributes {dimension_semantics = [#tpu.dimension_semantics<parallel>, #tpu.dimension_semantics<parallel>], iteration_bounds = array<i64: 2, 1>, scalar_prefetch = 0 : i64, scratch_operands = 0 : i64, tpu.core_type = #tpu.core_type<tc>, window_params = [{transform_indices = @transform_0, window_bounds = array<i64: 1, 8, 32>}, {pipeline_mode = #tpu.pipeline_mode<synchronous>, transform_indices = @transform_1, window_bounds = array<i64: 32, 32>}, {pipeline_mode = #tpu.pipeline_mode<synchronous>, transform_indices = @transform_2, window_bounds = array<i64: 32, 32>}, {pipeline_mode = #tpu.pipeline_mode<synchronous>, transform_indices = @transform_3, window_bounds = array<i64: 32, 32>}, {transform_indices = @transform_4, window_bounds = array<i64: 3, 32>}, {transform_indices = @transform_5, window_bounds = array<i64: 1, 1, 8>}, {transform_indices = @transform_6, window_bounds = array<i64: 1, 8, 32>}]} {
    %c32_i32 = arith.constant 32 : i32
    %0 = arith.muli %arg1, %c32_i32 : i32
    %1 = tpu.assume_multiple %0, 32 : i32
    %c0 = arith.constant 0 : index
    %c0_0 = arith.constant 0 : index
    %c0_1 = arith.constant 0 : index
    %2 = vector.load %arg2[%c0, %c0_0, %c0_1] : memref<1x8x32xf32, #tpu.memory_space<vmem>>, vector<1x8x32xf32>
    %3 = vector.shape_cast %2 : vector<1x8x32xf32> to vector<8x32xf32>
    %4 = arith.truncf %3 : vector<8x32xf32> to vector<8x32xbf16>
    %c0_2 = arith.constant 0 : index
    %c0_3 = arith.constant 0 : index
    %5 = vector.load %arg6[%c0_2, %c0_3] : memref<3x32xf32, #tpu.memory_space<vmem>>, vector<3x32xf32>
    %6 = vector.extract_strided_slice %5 {offsets = [0, 0], sizes = [1, 32], strides = [1, 1]} : vector<3x32xf32> to vector<1x32xf32>
    %7 = vector.extract_strided_slice %5 {offsets = [1, 0], sizes = [1, 32], strides = [1, 1]} : vector<3x32xf32> to vector<1x32xf32>
    %8 = vector.extract_strided_slice %5 {offsets = [2, 0], sizes = [1, 32], strides = [1, 1]} : vector<3x32xf32> to vector<1x32xf32>
    %9 = arith.index_cast %1 : i32 to index
    %c0_4 = arith.constant 0 : index
    %10 = vector.load %arg3[%9, %c0_4] : memref<32x32xf32, #tpu.memory_space<vmem>>, vector<32x32xf32>
    %11 = arith.truncf %10 : vector<32x32xf32> to vector<32x32xbf16>
    %cst = arith.constant dense<0.000000e+00> : vector<8x32xf32>
    %12 = tpu.matmul %4, %11, %cst {dimension_numbers = #tpu.dot_dimension_numbers<[1], [1], [0], [0], [0, 0, 1, 0], [], []>} : vector<8x32xbf16>, vector<32x32xbf16>, vector<8x32xf32> -> vector<8x32xf32>
    %13 = vector.broadcast %6 : vector<1x32xf32> to vector<8x32xf32>
    %14 = arith.addf %12, %13 : vector<8x32xf32>
    %cst_5 = arith.constant 0.353553385 : f32
    %15 = vector.broadcast %cst_5 : f32 to vector<8x32xf32>
    %16 = arith.mulf %14, %15 : vector<8x32xf32>
    %17 = arith.truncf %16 : vector<8x32xf32> to vector<8x32xbf16>
    %18 = arith.index_cast %1 : i32 to index
    %c0_6 = arith.constant 0 : index
    %19 = vector.load %arg4[%18, %c0_6] : memref<32x32xf32, #tpu.memory_space<vmem>>, vector<32x32xf32>
    %20 = arith.truncf %19 : vector<32x32xf32> to vector<32x32xbf16>
    %cst_7 = arith.constant dense<0.000000e+00> : vector<8x32xf32>
    %21 = tpu.matmul %4, %20, %cst_7 {dimension_numbers = #tpu.dot_dimension_numbers<[1], [1], [0], [0], [0, 0, 1, 0], [], []>} : vector<8x32xbf16>, vector<32x32xbf16>, vector<8x32xf32> -> vector<8x32xf32>
    %22 = vector.broadcast %7 : vector<1x32xf32> to vector<8x32xf32>
    %23 = arith.addf %21, %22 : vector<8x32xf32>
    %24 = arith.truncf %23 : vector<8x32xf32> to vector<8x32xbf16>
    %25 = arith.index_cast %1 : i32 to index
    %c0_8 = arith.constant 0 : index
    %26 = vector.load %arg5[%25, %c0_8] : memref<32x32xf32, #tpu.memory_space<vmem>>, vector<32x32xf32>
    %27 = arith.truncf %26 : vector<32x32xf32> to vector<32x32xbf16>
    %cst_9 = arith.constant dense<0.000000e+00> : vector<8x32xf32>
    %28 = tpu.matmul %4, %27, %cst_9 {dimension_numbers = #tpu.dot_dimension_numbers<[1], [1], [0], [0], [0, 0, 1, 0], [], []>} : vector<8x32xbf16>, vector<32x32xbf16>, vector<8x32xf32> -> vector<8x32xf32>
    %29 = vector.broadcast %8 : vector<1x32xf32> to vector<8x32xf32>
    %30 = arith.addf %28, %29 : vector<8x32xf32>
    %31 = arith.truncf %30 : vector<8x32xf32> to vector<8x32xbf16>
    %c0_10 = arith.constant 0 : index
    %c0_11 = arith.constant 0 : index
    %c0_12 = arith.constant 0 : index
    %32 = vector.load %arg7[%c0_10, %c0_11, %c0_12] : memref<1x1x8xf32, #tpu.memory_space<vmem>>, vector<1x1x8xf32>
    %33 = vector.shape_cast %32 : vector<1x1x8xf32> to vector<1x8xf32>
    %34 = vector.extract_strided_slice %17 {offsets = [0, 0], sizes = [8, 8], strides = [1, 1]} : vector<8x32xbf16> to vector<8x8xbf16>
    %35 = vector.extract_strided_slice %24 {offsets = [0, 0], sizes = [8, 8], strides = [1, 1]} : vector<8x32xbf16> to vector<8x8xbf16>
    %36 = vector.extract_strided_slice %31 {offsets = [0, 0], sizes = [8, 8], strides = [1, 1]} : vector<8x32xbf16> to vector<8x8xbf16>
    %cst_13 = arith.constant dense<0.000000e+00> : vector<8x8xf32>
    %37 = tpu.matmul %34, %35, %cst_13 {dimension_numbers = #tpu.dot_dimension_numbers<[1], [1], [0], [0], [0, 0, 1, 0], [], []>} : vector<8x8xbf16>, vector<8x8xbf16>, vector<8x8xf32> -> vector<8x8xf32>
    %38 = vector.broadcast %33 : vector<1x8xf32> to vector<8x8xf32>
    %39 = arith.addf %37, %38 : vector<8x8xf32>
    %cst_14 = arith.constant dense<0xFF800000> : vector<8xf32>
    %40 = vector.multi_reduction <maximumf>, %39, %cst_14 [1] : vector<8x8xf32> to vector<8xf32>
    %41 = vector.shape_cast %40 : vector<8xf32> to vector<8x1xf32>
    %42 = vector.broadcast %41 : vector<8x1xf32> to vector<8x8xf32>
    %43 = arith.subf %39, %42 : vector<8x8xf32>
    %44 = math.exp %43 : vector<8x8xf32>
    %cst_15 = arith.constant dense<0.000000e+00> : vector<8xf32>
    %45 = vector.multi_reduction <add>, %44, %cst_15 [1] : vector<8x8xf32> to vector<8xf32>
    %46 = vector.shape_cast %45 : vector<8xf32> to vector<8x1xf32>
    %47 = tpu.reciprocal %46 {approx = true} : vector<8x1xf32> -> vector<8x1xf32>
    %48 = vector.broadcast %47 : vector<8x1xf32> to vector<8x8xf32>
    %49 = arith.mulf %44, %48 : vector<8x8xf32>
    %50 = arith.truncf %49 : vector<8x8xf32> to vector<8x8xbf16>
    %cst_16 = arith.constant dense<0.000000e+00> : vector<8x8xf32>
    %51 = tpu.matmul %50, %36, %cst_16 {dimension_numbers = #tpu.dot_dimension_numbers<[1], [0], [0], [1], [0, 0, 1, 1], [], []>} : vector<8x8xbf16>, vector<8x8xbf16>, vector<8x8xf32> -> vector<8x8xf32>
    %52 = vector.extract_strided_slice %17 {offsets = [0, 8], sizes = [8, 8], strides = [1, 1]} : vector<8x32xbf16> to vector<8x8xbf16>
    %53 = vector.extract_strided_slice %24 {offsets = [0, 8], sizes = [8, 8], strides = [1, 1]} : vector<8x32xbf16> to vector<8x8xbf16>
    %54 = vector.extract_strided_slice %31 {offsets = [0, 8], sizes = [8, 8], strides = [1, 1]} : vector<8x32xbf16> to vector<8x8xbf16>
    %cst_17 = arith.constant dense<0.000000e+00> : vector<8x8xf32>
    %55 = tpu.matmul %52, %53, %cst_17 {dimension_numbers = #tpu.dot_dimension_numbers<[1], [1], [0], [0], [0, 0, 1, 0], [], []>} : vector<8x8xbf16>, vector<8x8xbf16>, vector<8x8xf32> -> vector<8x8xf32>
    %56 = vector.broadcast %33 : vector<1x8xf32> to vector<8x8xf32>
    %57 = arith.addf %55, %56 : vector<8x8xf32>
    %cst_18 = arith.constant dense<0xFF800000> : vector<8xf32>
    %58 = vector.multi_reduction <maximumf>, %57, %cst_18 [1] : vector<8x8xf32> to vector<8xf32>
    %59 = vector.shape_cast %58 : vector<8xf32> to vector<8x1xf32>
    %60 = vector.broadcast %59 : vector<8x1xf32> to vector<8x8xf32>
    %61 = arith.subf %57, %60 : vector<8x8xf32>
    %62 = math.exp %61 : vector<8x8xf32>
    %cst_19 = arith.constant dense<0.000000e+00> : vector<8xf32>
    %63 = vector.multi_reduction <add>, %62, %cst_19 [1] : vector<8x8xf32> to vector<8xf32>
    %64 = vector.shape_cast %63 : vector<8xf32> to vector<8x1xf32>
    %65 = tpu.reciprocal %64 {approx = true} : vector<8x1xf32> -> vector<8x1xf32>
    %66 = vector.broadcast %65 : vector<8x1xf32> to vector<8x8xf32>
    %67 = arith.mulf %62, %66 : vector<8x8xf32>
    %68 = arith.truncf %67 : vector<8x8xf32> to vector<8x8xbf16>
    %cst_20 = arith.constant dense<0.000000e+00> : vector<8x8xf32>
    %69 = tpu.matmul %68, %54, %cst_20 {dimension_numbers = #tpu.dot_dimension_numbers<[1], [0], [0], [1], [0, 0, 1, 1], [], []>} : vector<8x8xbf16>, vector<8x8xbf16>, vector<8x8xf32> -> vector<8x8xf32>
    %70 = vector.extract_strided_slice %17 {offsets = [0, 16], sizes = [8, 8], strides = [1, 1]} : vector<8x32xbf16> to vector<8x8xbf16>
    %71 = vector.extract_strided_slice %24 {offsets = [0, 16], sizes = [8, 8], strides = [1, 1]} : vector<8x32xbf16> to vector<8x8xbf16>
    %72 = vector.extract_strided_slice %31 {offsets = [0, 16], sizes = [8, 8], strides = [1, 1]} : vector<8x32xbf16> to vector<8x8xbf16>
    %cst_21 = arith.constant dense<0.000000e+00> : vector<8x8xf32>
    %73 = tpu.matmul %70, %71, %cst_21 {dimension_numbers = #tpu.dot_dimension_numbers<[1], [1], [0], [0], [0, 0, 1, 0], [], []>} : vector<8x8xbf16>, vector<8x8xbf16>, vector<8x8xf32> -> vector<8x8xf32>
    %74 = vector.broadcast %33 : vector<1x8xf32> to vector<8x8xf32>
    %75 = arith.addf %73, %74 : vector<8x8xf32>
    %cst_22 = arith.constant dense<0xFF800000> : vector<8xf32>
    %76 = vector.multi_reduction <maximumf>, %75, %cst_22 [1] : vector<8x8xf32> to vector<8xf32>
    %77 = vector.shape_cast %76 : vector<8xf32> to vector<8x1xf32>
    %78 = vector.broadcast %77 : vector<8x1xf32> to vector<8x8xf32>
    %79 = arith.subf %75, %78 : vector<8x8xf32>
    %80 = math.exp %79 : vector<8x8xf32>
    %cst_23 = arith.constant dense<0.000000e+00> : vector<8xf32>
    %81 = vector.multi_reduction <add>, %80, %cst_23 [1] : vector<8x8xf32> to vector<8xf32>
    %82 = vector.shape_cast %81 : vector<8xf32> to vector<8x1xf32>
    %83 = tpu.reciprocal %82 {approx = true} : vector<8x1xf32> -> vector<8x1xf32>
    %84 = vector.broadcast %83 : vector<8x1xf32> to vector<8x8xf32>
    %85 = arith.mulf %80, %84 : vector<8x8xf32>
    %86 = arith.truncf %85 : vector<8x8xf32> to vector<8x8xbf16>
    %cst_24 = arith.constant dense<0.000000e+00> : vector<8x8xf32>
    %87 = tpu.matmul %86, %72, %cst_24 {dimension_numbers = #tpu.dot_dimension_numbers<[1], [0], [0], [1], [0, 0, 1, 1], [], []>} : vector<8x8xbf16>, vector<8x8xbf16>, vector<8x8xf32> -> vector<8x8xf32>
    %88 = vector.extract_strided_slice %17 {offsets = [0, 24], sizes = [8, 8], strides = [1, 1]} : vector<8x32xbf16> to vector<8x8xbf16>
    %89 = vector.extract_strided_slice %24 {offsets = [0, 24], sizes = [8, 8], strides = [1, 1]} : vector<8x32xbf16> to vector<8x8xbf16>
    %90 = vector.extract_strided_slice %31 {offsets = [0, 24], sizes = [8, 8], strides = [1, 1]} : vector<8x32xbf16> to vector<8x8xbf16>
    %cst_25 = arith.constant dense<0.000000e+00> : vector<8x8xf32>
    %91 = tpu.matmul %88, %89, %cst_25 {dimension_numbers = #tpu.dot_dimension_numbers<[1], [1], [0], [0], [0, 0, 1, 0], [], []>} : vector<8x8xbf16>, vector<8x8xbf16>, vector<8x8xf32> -> vector<8x8xf32>
    %92 = vector.broadcast %33 : vector<1x8xf32> to vector<8x8xf32>
    %93 = arith.addf %91, %92 : vector<8x8xf32>
    %cst_26 = arith.constant dense<0xFF800000> : vector<8xf32>
    %94 = vector.multi_reduction <maximumf>, %93, %cst_26 [1] : vector<8x8xf32> to vector<8xf32>
    %95 = vector.shape_cast %94 : vector<8xf32> to vector<8x1xf32>
    %96 = vector.broadcast %95 : vector<8x1xf32> to vector<8x8xf32>
    %97 = arith.subf %93, %96 : vector<8x8xf32>
    %98 = math.exp %97 : vector<8x8xf32>
    %cst_27 = arith.constant dense<0.000000e+00> : vector<8xf32>
    %99 = vector.multi_reduction <add>, %98, %cst_27 [1] : vector<8x8xf32> to vector<8xf32>
    %100 = vector.shape_cast %99 : vector<8xf32> to vector<8x1xf32>
    %101 = tpu.reciprocal %100 {approx = true} : vector<8x1xf32> -> vector<8x1xf32>
    %102 = vector.broadcast %101 : vector<8x1xf32> to vector<8x8xf32>
    %103 = arith.mulf %98, %102 : vector<8x8xf32>
    %104 = arith.truncf %103 : vector<8x8xf32> to vector<8x8xbf16>
    %cst_28 = arith.constant dense<0.000000e+00> : vector<8x8xf32>
    %105 = tpu.matmul %104, %90, %cst_28 {dimension_numbers = #tpu.dot_dimension_numbers<[1], [0], [0], [1], [0, 0, 1, 1], [], []>} : vector<8x8xbf16>, vector<8x8xbf16>, vector<8x8xf32> -> vector<8x8xf32>
    %106 = tpu.concatenate %51, %69, %87, %105 in 1 : vector<8x8xf32>, vector<8x8xf32>, vector<8x8xf32>, vector<8x8xf32> -> vector<8x32xf32>
    %c0_29 = arith.constant 0 : index
    %c0_30 = arith.constant 0 : index
    %c0_31 = arith.constant 0 : index
    %107 = vector.load %arg8[%c0_29, %c0_30, %c0_31] : memref<1x8x32xf32, #tpu.memory_space<vmem>>, vector<1x8x32xf32>
    %108 = vector.shape_cast %107 : vector<1x8x32xf32> to vector<8x32xf32>
    %109 = vector.shape_cast %106 : vector<8x32xf32> to vector<1x8x32xf32>
    tpu.vector_store %arg8[%c0_29, %c0_30, %c0_31], %109 {strides = array<i32>} : memref<1x8x32xf32, #tpu.memory_space<vmem>>, vector<1x8x32xf32>,
    return
  }
  func.func @transform_0(%arg0: i32, %arg1: i32) -> (i32, i32, i32) {
    %c0_i32 = arith.constant 0 : i32
    %c0_i32_0 = arith.constant 0 : i32
    %c0_i32_1 = arith.constant 0 : i32
    return %arg0, %c0_i32, %c0_i32_0 : i32, i32, i32
  }
  func.func @transform_1(%arg0: i32, %arg1: i32) -> (i32, i32) {
    %c0_i32 = arith.constant 0 : i32
    %c0_i32_0 = arith.constant 0 : i32
    %c0_i32_1 = arith.constant 0 : i32
    return %c0_i32, %c0_i32_0 : i32, i32
  }
  func.func @transform_2(%arg0: i32, %arg1: i32) -> (i32, i32) {
    %c0_i32 = arith.constant 0 : i32
    %c0_i32_0 = arith.constant 0 : i32
    %c0_i32_1 = arith.constant 0 : i32
    return %c0_i32, %c0_i32_0 : i32, i32
  }
  func.func @transform_3(%arg0: i32, %arg1: i32) -> (i32, i32) {
    %c0_i32 = arith.constant 0 : i32
    %c0_i32_0 = arith.constant 0 : i32
    %c0_i32_1 = arith.constant 0 : i32
    return %c0_i32, %c0_i32_0 : i32, i32
  }
  func.func @transform_4(%arg0: i32, %arg1: i32) -> (i32, i32) {
    %c0_i32 = arith.constant 0 : i32
    %c0_i32_0 = arith.constant 0 : i32
    return %c0_i32, %arg1 : i32, i32
  }
  func.func @transform_5(%arg0: i32, %arg1: i32) -> (i32, i32, i32) {
    %c0_i32 = arith.constant 0 : i32
    %c0_i32_0 = arith.constant 0 : i32
    %c0_i32_1 = arith.constant 0 : i32
    return %arg0, %c0_i32, %c0_i32_0 : i32, i32, i32
  }
  func.func @transform_6(%arg0: i32, %arg1: i32) -> (i32, i32, i32) {
    %c0_i32 = arith.constant 0 : i32
    %c0_i32_0 = arith.constant 0 : i32
    return %arg0, %c0_i32, %arg1 : i32, i32, i32
  }
}

</mosaic_0001>

<bundles_post_ra>
// kernel: tpu_custom_call.1
= control target key start
LH: loop header
LB: loop body
LE: loop exit
PB: predicated region body
PF: predicated region fallthrough
CT: control target
= control target key end

     0   :  { %s1944_s0 = inlined_call_operand.hbm [shape: f32[2,8,32], index: 0, kind: input, shape index: {}]   ;;  %s1945_s1 = inlined_call_operand.hbm [shape: f32[32,32], index: 1, kind: input, shape index: {}]   ;;  %s1946_s2 = inlined_call_operand.hbm [shape: f32[32,32], index: 2, kind: input, shape index: {}]   ;;  %s1947_s3 = inlined_call_operand.hbm [shape: f32[32,32], index: 3, kind: input, shape index: {}]   ;;  %s1948_s4 = inlined_call_operand.vmem [shape: f32[3,32], index: 4, kind: input, shape index: {}]   ;;  %s1949_s5 = inlined_call_operand.vmem [shape: f32[2,1,8], index: 5, kind: input, shape index: {}]   ;;  %s1950_s6 = inlined_call_operand.hbm [shape: f32[2,8,32], index: 6, kind: output, shape index: {}]  }
   0x1   :  { %1955 = sst [smem:[#allocation15_spill]] %s1945_s1 }
   0x2   :  { %1956 = sst [smem:[#allocation16_spill]] %s1946_s2 }
   0x3   :  { %11 = vsyncpa [#allocation3], 0 }
   0x4   :  { %13 = vsyncpa [#allocation3 + $0x1], 0 }
   0x5   :  { %14 = vsyncpa [#allocation6], 0 }
   0x6   :  { %15 = vsyncpa [#allocation9], 0 }
   0x7   :  { %16 = vsyncpa [#allocation4], 0 }
   0x8   :  { %18 = vsyncpa [#allocation4 + $0x1], 0  ;;  %s1651_s21 = smov 0   ;;  %s1653_s22 = smov 0  }
   0x9   :  { %s1655_s23 = smov 0   ;;  %s1657_s24 = smov 0  }
   0xa   :  { %s1659_s25 = smov 0   ;;  %s1661_s26 = smov 0  }
   0xb LB: > { %s1157_s27 = sadd.s32 4294967295, %s1599_s26   ;;  %s1158_s28 = sadd.s32 4294967294, %s1599_s26   ;;  %s1599_s26 = sphi %s1661_s26, %s24_s26   ;;  %s1595_s25 = sphi %s1659_s25, %s1976_s25   ;;  %s1591_s24 = sphi %s1657_s24, %s1975_s24   ;;  %s1587_s23 = sphi %s1655_s23, %s1974_s23   ;;  %s1583_s22 = sphi %s1653_s22, %s1973_s22   ;;  %s1579_s21 = sphi %s1651_s21, %s1972_s21  }
   0xc   : > { %p56_p0 = scmp.ne.s32.totalorder %s1583_s22, %s1579_s21  ;;  %p1685_p1 = scmp.eq.s32.totalorder %s1157_s27, 0 }
   0xd   : > { %p1689_p2 = scmp.eq.s32.totalorder %s1157_s27, 1  ;;  %p203_p3 = scmp.eq.s32.totalorder %s1158_s28, 1 }
   0xe   : > { %s1957_s29 = scalar_select %p1685_p1, 1, 0 }
   0xf   : > { %p1695_p4 = por %p1685_p1, %p56_p0  ;;  %p1159_p5 = scmp.ge.s32.totalorder %s1599_s26, 1 }
  0x10   : > { %p1700_p6 = por %p203_p3, %p56_p0  ;;  %p210_p7 = scmp.lt.s32.totalorder %s1599_s26, 3 }
  0x11   : > { %s1959_s7 = scalar_select %p1695_p4, 1, 0 }
  0x12   : > { %s1960_s8 = scalar_select %p1700_p6, 1, 0 }
  0x13   : > { %p1705_p8 = pnand %p1159_p5, %p210_p7  ;;  %s1601_s10 = smov [#allocation5]  }
  0x14   : > { %s222_s11 = sshll.u32 %s1601_s10, 4  ;;  %s1602_s13 = smov [#allocation7]   ;;  %s223_s11 = int_to_ptr.vmem [resolvable:$true] %s222_s11 }
  0x15   : > { %s1961_s9 = scalar_select %p1705_p8, 1, 0 }
  0x16   : > { %p1302_p9 = pneg %p1705_p8  ;;  %s235_s14 = sshll.u32 %s1602_s13, 4  ;;  %s236_s14 = int_to_ptr.vmem [resolvable:$true] %s235_s14 }
  0x17   : > { %s1603_s15 = smov [#allocation8]   ;;  %s1416_s17 = scalar_lea.vmem %s223_s11, 512 }
  0x18   : > { %p1714_p11 = pnand %p1302_p9, %p1685_p1  ;;  %s248_s16 = sshll.u32 %s1603_s15, 4  ;;  %s249_s16 = int_to_ptr.vmem [resolvable:$true] %s248_s16 }
  0x19   : > { %p1417_p13 = scmp.ne.s32.totalorder %s223_s11, %s1416_s17  ;;  %p1424_p5 = scmp.lt.s32.totalorder %s223_s11, %s223_s11 }
  0x1a   : > { %p1407_p12 = pneg %p1714_p11  ;;  %p1425_p7 = scmp.lt.s32.totalorder %s1416_s17, %s1416_s17 }
  0x1c   : > { %p1419_p0 = pnand %p1417_p13, %p1407_p12  ;;  %p1426_p9 = por %p1425_p7, %p1424_p5 }
  0x1e   : > { %p1420_p3 = pneg %p1419_p0 }
  0x20   : > { %p1427_p10 = pnand %p1426_p9, %p1420_p3 }
  0x22   : > { %1430 = shalt.err (!%p1427_p10)
}
  0x23   : > { %s1604_s18 = smov 128   ;;  %s1605_s19 = smov 8  }
  0x24   : > { %s1963_s1 = sld [smem:[#allocation15_spill]]  ;;  %s1442_s28 = scalar_lea.vmem %s236_s14, 512 }
  0x25   : > { %p1443_p6 = scmp.ne.s32.totalorder %s236_s14, %s1442_s28  ;;  %p1450_p1 = scmp.lt.s32.totalorder %s236_s14, %s236_s14 }
  0x26   : > { %p1451_p4 = scmp.lt.s32.totalorder %s1442_s28, %s1442_s28 }
  0x27   : > { %p1445_p13 = pnand %p1443_p6, %p1407_p12 }
  0x28   : > { %p1452_p5 = por %p1451_p4, %p1450_p1 }
  0x29   : > { %p1446_p0 = pneg %p1445_p13 }
  0x2a   : > { %1305 = dma.hbm_to_vmem [thread:$0]  (!%p1714_p11), %s1963_s1, 512, %s223_s11, [#allocation6], %s1604_s18, %s1604_s18, %s1605_s19  }
  0x2b   : > { %p1453_p3 = pnand %p1452_p5, %p1446_p0 }
  0x2d   : > { %1456 = shalt.err (!%p1453_p3)
}
  0x2e   : > { %s1964_s2 = sld [smem:[#allocation16_spill]]  ;;  %s1468_s11 = scalar_lea.vmem %s249_s16, 512 }
  0x2f   : > { %p1469_p10 = scmp.ne.s32.totalorder %s249_s16, %s1468_s11  ;;  %p1476_p9 = scmp.lt.s32.totalorder %s249_s16, %s249_s16 }
  0x30   : > { %p1477_p13 = scmp.lt.s32.totalorder %s1468_s11, %s1468_s11 }
  0x31   : > { %p1471_p7 = pnand %p1469_p10, %p1407_p12 }
  0x32   : > { %p1478_p8 = por %p1477_p13, %p1476_p9 }
  0x33   : > { %p1472_p6 = pneg %p1471_p7 }
  0x34   : > { %1308 = dma.hbm_to_vmem [thread:$0]  (!%p1714_p11), %s1964_s2, 512, %s236_s14, [#allocation6], %s1604_s18, %s1604_s18, %s1605_s19  }
  0x35   : > { %p1479_p1 = pnand %p1478_p8, %p1472_p6 }
  0x37   : > { %1482 = shalt.err (!%p1479_p1)
}
  0x38   : > { %1311 = dma.hbm_to_vmem [thread:$0]  (!%p1714_p11), %s1947_s3, 512, %s249_s16, [#allocation9], %s1604_s18, %s1604_s18, %s1605_s19  }
  0x39   : > { %s43_s14 = sadd.s32 1, %s1587_s23  ;;  %s36_s20 = sadd.s32 1, %s1595_s25 }
  0x3a   : > { %p50_p4 = scmp.ne.s32.totalorder %s1587_s23, %s1583_s22  ;;  %p38_p8 = scmp.ge.s32.totalorder %s36_s20, 2 }
  0x3b   : > { %p51_p12 = scmp.eq.s32.totalorder %s1599_s26, 0  ;;  %p1323_p5 = scmp.lt.s32.totalorder %s1599_s26, 2 }
  0x3c   : > { %p1751_p0 = por %p1689_p2, %p50_p4  ;;  %s1978_s20 = smov (%p38_p8, %s36_s20), 0 }
  0x3d   : > { %p52_p3 = por %p51_p12, %p50_p4  ;;  %s269_s27 = sand.u32 1, %s1587_s23  }
  0x3e   : > { %s40_s28 = ssub.s32 %s1595_s25, %s1978_s20  ;;  %s1165_s16 = sshll.u32 %s269_s27, 3 }
  0x3f   : > { %p41_p10 = scmp.eq.s32.totalorder %s40_s28, 0  ;;  %s1166_s18 = sshll.u32 %s1595_s25, 7 }
  0x40   : > { %s278_s30 = scalar_lea.hbm %s1944_s0, %s1166_s18  ;;  %s273_s11 = scalar_lea.vmem [#allocation2], %s1165_s16 }
  0x41   : > { %s1763_s19 = scalar_select %p41_p10, %s1587_s23, %s43_s14  }
  0x42   : > { %s280_s15 = sshll.u32 %s273_s11, 4  ;;  %p1770_p2 = pnand %p1323_p5, %p52_p3  ;;  %s281_s15 = int_to_ptr.vmem [resolvable:$true] %s280_s15 }
  0x43   : > { %s270_s1 = scalar_lea.sflag [#allocation3], %s269_s27  ;;  %s1496_s28 = scalar_lea.vmem %s281_s15, 128 }
  0x44   : > { %p1485_p11 = pneg %p1770_p2  ;;  %p1497_p7 = scmp.ne.s32.totalorder %s281_s15, %s1496_s28 }
  0x45   : > { %s1606_s14 = smov [#allocation2]  }
  0x46   : > { %p1499_p6 = pnand %p1497_p7, %p1485_p11  ;;  %s1501_s2 = sshll.u32 %s1606_s14, 4  ;;  %s1502_s2 = int_to_ptr.vmem [resolvable:$false] %s1501_s2 }
  0x47   : > { %s1503_s18 = scalar_lea.vmem %s1502_s2, 256  ;;  %p1504_p13 = scmp.lt.s32.totalorder %s281_s15, %s1502_s2 }
  0x48   : > { %p1500_p9 = pneg %p1499_p6  ;;  %p1505_p1 = scmp.lt.s32.totalorder %s1503_s18, %s1496_s28 }
  0x4a   : > { %p1506_p4 = por %p1505_p1, %p1504_p13 }
  0x4c   : > { %p1507_p8 = pnand %p1506_p4, %p1500_p9 }
  0x4e   : > { %1510 = shalt.err (!%p1507_p8)
}
  0x4f   : > { %1315 = dma.hbm_to_vmem [thread:$0]  (!%p1770_p2), %s278_s30, 128, %s281_s15, %s270_s1  }
  0x50   : > { %p1967_p12 = scmp.ne.s32.totalorder %s1961_s9, 0 }
  0x51   : > { %s1781_s27 = sand.u32 (!%p1967_p12), 1, %s1583_s22   ;;  %p1968_p5 = scmp.ne.s32.totalorder (!%p1967_p12), %s1959_s7, 0 }
  0x52   : > { %295 = sbr.rel (%p1967_p12) target bundleno = 1280 (0x500), region = 44  ;;  %s1168_s16 = sshll.u32 (!%p1967_p12), %s1781_s27, 3 }
  0x53   : > { %s298_s10 = scalar_lea.sflag (!%p1967_p12), [#allocation3], %s1781_s27  ;;  %s1787_s2 = scalar_lea.vmem (!%p1967_p12), [#allocation2], %s1168_s16 }
  0x57   : > { %1562 = dma.done.wait (%p1968_p5), %s298_s10, 128  }
  0x58   : > { %1564 = vsyncadd (%p1968_p5), %s298_s10, 4294967168  ;;  %p1969_p3 = scmp.ne.s32.totalorder %s1957_s29, 0 }
  0x5a   : > { %1566 = dma.done.wait (%p1969_p3), [#allocation6], 1024  }
  0x5b   : > { %1568 = vsyncadd (%p1969_p3), [#allocation6], 4294966272 }
  0x5c   : > { %1570 = dma.done.wait (%p1969_p3), [#allocation9], 512  }
  0x5d   : > { %1572 = vsyncadd (%p1969_p3), [#allocation9], 4294966784  ;;  %v1607_v0 = vmov 0.0   ;;  %vm1608_vm0 = vmmov 0   ;;  %v364_v1 = vld [vmem:[#allocation5 + $0x10] sm:$0xff]  ;;  %v365_v2 = vld [vmem:[#allocation5 + $0x18] sm:$0xff]  ;;  %v368_v27 = vlaneseq }
  0x5e   : > { %1214 = vmatprep.subr.bf16.mxu0 %v1607_v0  ;;  %1222 = vmatprep.subr.bf16.mxu1 %v1607_v0  ;;  %vm372_vm1 = vcmask 261120   ;;  %v427_v3 = vld [vmem:[#allocation7 + $0x10] sm:$0xff]  ;;  %v367_v4 = vpack.c.bf16 %v365_v2, %v364_v1  ;;  %v428_v5 = vld [vmem:[#allocation7 + $0x18] sm:$0xff]  ;;  %v362_v7 = vld [vmem:[#allocation5] sm:$0xff]  ;;  %vm547_vm2 = vcmask 64512   ;;  %s1609_s7 = smov 112  }
  0x5f   : > { %1218 = vmatprep.mubr.msk.bf16.mxu0 %vm1608_vm0, %v1607_v0  ;;  %1226 = vmatprep.mubr.msk.bf16.mxu1 %vm1608_vm0, %v1607_v0  ;;  %v430_v6 = vpack.c.bf16 %v428_v5, %v427_v3  ;;  %v363_v8 = vld [vmem:[#allocation5 + $0x8] sm:$0xff]  ;;  %v425_v10 = vld [vmem:[#allocation7] sm:$0xff]  ;;  %v358_v17 = vld [vmem:[%s1787_s2] sm:$0xff]  ;;  %v369_v28 = vshrl.u32 %v368_v27, 7  ;;  %s1610_s9 = smov 120   ;;  %s1611_s13 = smov 104  }
  0x60   : > { %v380_v9 = vsel %vm372_vm1, %v367_v4, 0  ;;  %v426_v11 = vld [vmem:[#allocation7 + $0x8] sm:$0xff]  ;;  %v366_v13 = vpack.c.bf16 %v363_v8, %v362_v7  ;;  %v359_v18 = vpack.c.bf16 %v358_v17, %v358_v17  ;;  %v485_v19 = vld [vmem:[#allocation8 + $0x10] sm:$0xff]  ;;  %v486_v20 = vld [vmem:[#allocation8 + $0x18] sm:$0xff]  ;;  %vm609_vm3 = vcmask 1043456   ;;  %p353_p10 = scmp.lt.s32.totalorder %s1591_s24, 1 }
  0x61   : > { %1215 = vmatpush3.bf16.xpose.msra.mxu0 %v380_v9  ;;  %v439_v12 = vsel %vm372_vm1, %v430_v6, 0  ;;  %v429_v14 = vpack.c.bf16 %v426_v11, %v425_v10  ;;  %v488_v21 = vpack.c.bf16 %v486_v20, %v485_v19  ;;  %v483_v22 = vld [vmem:[#allocation8] sm:$0xff]  ;;  %v484_v23 = vld [vmem:[#allocation8 + $0x8] sm:$0xff]  ;;  %v370_v29 = vsub.s32 0, %v369_v28  ;;  %v360_v31 = vld [vmem:[%s1948_s4] sm:$0x7] }
  0x62   : > { %1223 = vmatpush3.bf16.xpose.msra.mxu1 %v439_v12  ;;  %1216 = vmatprep.subr.bf16.mxu0 %v1607_v0  ;;  %v377_v15 = vsel %vm372_vm1, %v366_v13, 0  ;;  %v487_v25 = vpack.c.bf16 %v484_v23, %v483_v22  ;;  %v433_v30 = vsub.s32 1, %v369_v28  ;;  %v491_v48 = vsub.s32 2, %v369_v28  ;;  %s354_s30 = scalar_select %p353_p10, %s1591_s24, 1 }
  0x63   : > { %1224 = vmatprep.subr.bf16.mxu1 %v1607_v0  ;;  %v436_v16 = vsel %vm372_vm1, %v429_v14, 0  ;;  %v497_v24 = vsel %vm372_vm1, %v488_v21, 0  ;;  %v371_v32 = vrot.slane %v360_v31, %v370_v29  ;;  %s1612_s28 = smov 8   ;;  %s1613_s14 = smov 16   ;;  %vm999_vm4 = vcmask 130048  }
  0x64   : > { %v494_v26 = vsel %vm372_vm1, %v487_v25, 0  ;;  %v434_v33 = vrot.slane %v360_v31, %v433_v30  ;;  %v492_v49 = vrot.slane %v360_v31, %v491_v48  ;;  %s355_s17 = scalar_lea.vmem %s1949_s5, %s354_s30  ;;  %s1614_s18 = smov 24   ;;  %vm1001_vm5 = vcmask 195584  }
  0x65   : > { %v1176_v3 = vld [vmem:[%s355_s17] ss:$0 sm:$0xff]  ;;  %s1186_s10 = sshll.u32 %s1591_s24, 7  ;;  %s348_s2 = scalar_lea.vmem [#allocation10], %s1168_s16 }
  0x66   : > { %s1019_s1 = sshll.u32 %s348_s2, 4  ;;  %s1615_s24 = smov [#allocation10]   ;;  %s1020_s1 = int_to_ptr.vmem [resolvable:$true] %s1019_s1 }
  0x67   : > { %s1511_s30 = scalar_lea.vmem %s1020_s1, 128  ;;  %s1515_s16 = sshll.u32 %s1615_s24, 4  ;;  %s1516_s16 = int_to_ptr.vmem [resolvable:$false] %s1515_s16 }
  0x68   : > { %p1512_p2 = scmp.ne.s32.totalorder %s1020_s1, %s1511_s30  ;;  %s1517_s11 = scalar_lea.vmem %s1516_s16, 256 }
  0x69   : > { %1217 = vmatpush3.bf16.xpose.msra.mxu0 %v377_v15  ;;  %p1518_p6 = scmp.lt.s32.totalorder %s1020_s1, %s1516_s16  ;;  %p1519_p9 = scmp.lt.s32.totalorder %s1517_s11, %s1511_s30 }
  0x6a   : > { %1225 = vmatpush3.bf16.xpose.msra.mxu1 %v436_v16  ;;  %1230 = vmatprep.subr.bf16.mxu0 %v1607_v0  ;;  %p1513_p11 = pnand %p1512_p2, %p1751_p0 }
  0x6b   : > { %1238 = vmatprep.subr.bf16.mxu1 %v1607_v0  ;;  %p1520_p13 = por %p1519_p9, %p1518_p6 }
  0x6c   : > { %p1514_p7 = pneg %p1513_p11 }
  0x6e   : > { %p1521_p1 = pnand %p1520_p13, %p1514_p7 }
  0x70   : > { %1219 = vmatmul.mubr.msk.bf16.vlgmr.msra.gmra.mxu0 %vm372_vm1, %v359_v18 }
  0x71   : > { %1227 = vmatmul.mubr.msk.bf16.vlgmr.msra.gmra.mxu1 %vm372_vm1, %v359_v18  ;;  %1234 = vmatprep.mubr.msk.bf16.mxu0 %vm1608_vm0, %v1607_v0 }
  0x72   : > { %1240 = vmatprep.mubr.msk.bf16.mxu1 %vm1608_vm0, %v1607_v0  ;;  %1231 = vmatpush3.bf16.xpose.msra.mxu0 %v497_v24 }
  0x73   : > { %1232 = vmatprep.subr.bf16.mxu0 %v1607_v0 }
  0x7a   : > { %1233 = vmatpush3.bf16.xpose.msra.mxu0 %v494_v26 }
  0x7b   : > { %1250 = vmatprep.subr.bf16.mxu0 %v1607_v0 }
  0x81   : > { %1235 = vmatmul.mubr.msk.bf16.vlgmr.msra.gmra.mxu0 %vm372_vm1, %v359_v18 }
  0x82   : > { %1252 = vmatprep.mubr.msk.bf16.mxu0 %vm1608_vm0, %v1607_v0 }
 0x130   : > { %v416_v34 = vpop.f32.mrf.mxu0 }
 0x131   : > { %v417_v35 = vadd.f32 %v416_v34, %v371_v32  ;;  %v475_v36 = vpop.f32.mrf.mxu1 }
 0x132   : > { %v476_v37 = vadd.f32 %v475_v36, %v434_v33  ;;  %v1220_v38 = vpop.f32.mrf.mxu0 }
 0x133   : > { %v422_v39 = vmul.f32 0.35355338, %v417_v35  ;;  %v1228_v40 = vpop.f32.mrf.mxu1 }
 0x134   : > { %v481_v41 = vpack.c.bf16 %v476_v37, %v476_v37  ;;  %v419_v42 = vpop.f32.mrf.mxu0 }
 0x135   : > { %v478_v43 = vpop.f32.mrf.mxu1  ;;  %v423_v44 = vpack.c.bf16 %v422_v39, %v422_v39 }
 0x136   : > { %768 = vrot.lane.b32.xlu1 %v481_v41, %s1609_s7  ;;  %657 = vrot.lane.b32.xlu0 %v481_v41, %s1610_s9  ;;  %v1221_v45 = vpop.f32.mrf.mxu0  ;;  %v552_v46 = vsel %vm547_vm2, %v481_v41, 0 }
 0x137   : > { %v1229_v47 = vpop.f32.mrf.mxu1  ;;  %1239 = vmatpush3.bf16.xpose.msra.mxu1 %v552_v46 }
 0x138   : > { %1244 = vmatprep.subr.bf16.mxu1 %v1607_v0 }
 0x13a   : > { %766 = vrot.lane.b32.xlu1 %v423_v44, %s1609_s7  ;;  %654 = vrot.lane.b32.xlu0 %v423_v44, %s1610_s9 }
 0x13e   : > { %876 = vrot.lane.b32.xlu1 %v423_v44, %s1611_s13  ;;  %878 = vrot.lane.b32.xlu0 %v481_v41, %s1611_s13 }
 0x13f   : > { %1241 = vmatmul.mubr.msk.bf16.vlgmr.msra.gmra.mxu1 %vm547_vm2, %v423_v44 }
 0x140   : > { %1246 = vmatprep.mubr.msk.bf16.mxu1 %vm1608_vm0, %v1607_v0 }
 0x141   : > { %v533_v50 = vpop.f32.mrf.mxu0 }
 0x142   : > { %v534_v51 = vadd.f32 %v533_v50, %v492_v49 }
 0x143   : > { %v1236_v52 = vpop.f32.mrf.mxu0 }
 0x144   : > { %v1843_v53 = vpack.c.bf16 %v534_v51, %v534_v51 }
 0x145   : > { %v536_v54 = vpop.f32.mrf.mxu0 }
 0x146   : > { %v611_v55 = vsel %vm609_vm3, %v1843_v53, 0 }
 0x147   : > { %v1237_v56 = vpop.f32.mrf.mxu0  ;;  %1245 = vmatpush3.bf16.msra.mxu1 %v611_v55 }
 0x148   : > { %1256 = vmatprep.subr.bf16.mxu1 %v1607_v0 }
 0x1a8   : > { %v658_v57 = vpop.permute.xlu0 %657  ;;  %v769_v59 = vpop.permute.xlu1 %768 }
 0x1a9   : > { %v663_v58 = vsel %vm547_vm2, %v658_v57, 0  ;;  %v774_v61 = vsel %vm547_vm2, %v769_v59, 0 }
 0x1aa   : > { %1251 = vmatpush3.bf16.xpose.msra.mxu0 %v663_v58 }
 0x1ab   : > { %1262 = vmatprep.subr.bf16.mxu0 %v1607_v0 }
 0x1ac   : > { %v655_v60 = vpop.permute.xlu0 %654  ;;  %v767_v63 = vpop.permute.xlu1 %766 }
 0x1b0   : > { %v879_v62 = vpop.permute.xlu0 %878  ;;  %v877_v2 = vpop.permute.xlu1 %876 }
 0x1b1   : > { %1253 = vmatmul.mubr.msk.bf16.vlgmr.msra.gmra.mxu0 %vm547_vm2, %v655_v60  ;;  %v884_v1 = vsel %vm547_vm2, %v879_v62, 0 }
 0x1b2   : > { %1263 = vmatpush3.bf16.xpose.msra.mxu0 %v774_v61  ;;  %1264 = vmatprep.mubr.msk.bf16.mxu0 %vm1608_vm0, %v1607_v0 }
 0x1b3   : > { %1274 = vmatprep.subr.bf16.mxu0 %v1607_v0 }
 0x1b9   : > { %1265 = vmatmul.mubr.msk.bf16.vlgmr.msra.gmra.mxu0 %vm547_vm2, %v767_v63 }
 0x1ba   : > { %1275 = vmatpush3.bf16.xpose.msra.mxu0 %v884_v1  ;;  %1276 = vmatprep.mubr.msk.bf16.mxu0 %vm1608_vm0, %v1607_v0 }
 0x1c1   : > { %1277 = vmatmul.mubr.msk.bf16.vlgmr.msra.gmra.mxu0 %vm547_vm2, %v877_v2 }
 0x1ff   : > { %v588_v4 = vpop.f32.mrf.mxu1 }
 0x200   : > { %v589_v5 = vadd.f32 %v1176_v3, %v588_v4 }
 0x201   : > { %v1242_v6 = vpop.f32.mrf.mxu1 }
 0x202   : > { %v594_v7 = vsel %vm547_vm2, %v589_v5, -inf }
 0x203   : > { %595 = vmax.xlane.f32.xlu0 %v594_v7  ;;  %v591_v8 = vpop.f32.mrf.mxu1 }
 0x205   : > { %v1243_v9 = vpop.f32.mrf.mxu1 }
 0x271   : > { %v699_v10 = vpop.f32.mrf.mxu0 }
 0x272   : > { %v700_v11 = vadd.f32 %v1176_v3, %v699_v10 }
 0x273   : > { %v1254_v12 = vpop.f32.mrf.mxu0 }
 0x274   : > { %v705_v13 = vsel %vm547_vm2, %v700_v11, -inf }
 0x275   : > { %706 = vmax.xlane.f32.xlu1 %v705_v13  ;;  %v702_v14 = vpop.f32.mrf.mxu0 }
 0x277   : > { %v1255_v15 = vpop.f32.mrf.mxu0 }
 0x279   : > { %v810_v16 = vpop.f32.mrf.mxu0 }
 0x27a   : > { %v811_v17 = vadd.f32 %v1176_v3, %v810_v16 }
 0x27b   : > { %v1266_v18 = vpop.f32.mrf.mxu0 }
 0x27c   : > { %v816_v19 = vsel %vm547_vm2, %v811_v17, -inf }
 0x27d   : > { %817 = vmax.xlane.f32.xlu0 %v816_v19  ;;  %v813_v20 = vpop.f32.mrf.mxu0 }
 0x27f   : > { %v1267_v21 = vpop.f32.mrf.mxu0 }
 0x281   : > { %v920_v22 = vpop.f32.mrf.mxu0 }
 0x282   : > { %v921_v23 = vadd.f32 %v1176_v3, %v920_v22 }
 0x283   : > { %v1278_v24 = vpop.f32.mrf.mxu0 }
 0x284   : > { %v926_v25 = vsel %vm547_vm2, %v921_v23, -inf }
 0x285   : > { %927 = vmax.xlane.f32.xlu0 %v926_v25  ;;  %v923_v26 = vpop.f32.mrf.mxu0 }
 0x287   : > { %v1279_v27 = vpop.f32.mrf.mxu0 }
 0x28c   : > { %v596_v28 = vpop.xlane.xlu0 %595 }
 0x28d   : > { %v597_v29 = vsub.f32 %v589_v5, %v596_v28 }
 0x28f   : > { %v598_v30 = vmul.f32 1.442695, %v597_v29 }
 0x291   : > { %1389 = vpow2.f32 %v598_v30 }
 0x29e   : > { %v1390_v31 = vpop.eup %1389 }
 0x29f   : > { %v600_v32 = vsel %vm547_vm2, %v1390_v31, 0.0 }
 0x2a0   : > { %601 = vadd.xlane.f32.xlu1 %v600_v32 }
 0x2b1   : > { %718 = vrot.lane.b32.xlu1 %v1843_v53, %s1610_s9  ;;  %s1901_s9 = scalar_lea.hbm %s1950_s6, %s1186_s10 }
 0x2fe   : > { %v707_v33 = vpop.xlane.xlu1 %706 }
 0x2ff   : > { %v708_v34 = vsub.f32 %v700_v11, %v707_v33 }
 0x301   : > { %v709_v35 = vmul.f32 1.442695, %v708_v34 }
 0x303   : > { %1391 = vpow2.f32 %v709_v35 }
 0x306   : > { %v818_v36 = vpop.xlane.xlu0 %817 }
 0x307   : > { %v819_v37 = vsub.f32 %v811_v17, %v818_v36 }
 0x309   : > { %v820_v38 = vmul.f32 1.442695, %v819_v37 }
 0x30b   : > { %1393 = vpow2.f32 %v820_v38 }
 0x30e   : > { %v928_v39 = vpop.xlane.xlu0 %927 }
 0x30f   : > { %v929_v40 = vsub.f32 %v921_v23, %v928_v39 }
 0x310   : > { %v1392_v41 = vpop.eup %1391 }
 0x311   : > { %v930_v42 = vmul.f32 1.442695, %v929_v40  ;;  %v711_v43 = vsel %vm547_vm2, %v1392_v41, 0.0 }
 0x312   : > { %712 = vadd.xlane.f32.xlu0 %v711_v43 }
 0x313   : > { %1395 = vpow2.f32 %v930_v42 }
 0x318   : > { %v1394_v44 = vpop.eup %1393 }
 0x319   : > { %v822_v45 = vsel %vm547_vm2, %v1394_v44, 0.0 }
 0x31a   : > { %823 = vadd.xlane.f32.xlu1 %v822_v45 }
 0x320   : > { %v1396_v46 = vpop.eup %1395 }
 0x321   : > { %v932_v47 = vsel %vm547_vm2, %v1396_v46, 0.0 }
 0x322   : > { %933 = vadd.xlane.f32.xlu0 %v932_v47 }
 0x329   : > { %v602_v48 = vpop.xlane.xlu1 %601 }
 0x32a   : > { %1397 = vrcp.f32 %v602_v48 }
 0x32b   : > { %938 = vrot.lane.b32.xlu1 %v1843_v53, %s1611_s13  ;;  %s1005_s13 = scalar_lea.sflag [#allocation4], %s1781_s27 }
 0x32d   : > { %v719_v51 = vpop.permute.xlu1 %718 }
 0x32e   : > { %v724_v54 = vsel %vm609_vm3, %v719_v51, 0 }
 0x337   : > { %v1398_v49 = vpop.eup %1397 }
 0x338   : > { %828 = vrot.lane.b32.xlu0 %v1843_v53, %s1609_s7  ;;  %v604_v50 = vmul.f32 %v1398_v49, %v1390_v31 }
 0x33a   : > { %v605_v52 = vpack.c.bf16 %v604_v50, %v604_v50 }
 0x33c   : > { %1247 = vmatmul.mubr.msk.bf16.vlgmr.msra.gmra.mxu1 %vm547_vm2, %v605_v52 }
 0x33d   : > { %1257 = vmatpush3.bf16.msra.mxu1 %v724_v54  ;;  %1258 = vmatprep.mubr.msk.bf16.mxu1 %vm1608_vm0, %v1607_v0 }
 0x33e   : > { %1268 = vmatprep.subr.bf16.mxu1 %v1607_v0 }
 0x39b   : > { %v713_v55 = vpop.xlane.xlu0 %712 }
 0x39c   : > { %1399 = vrcp.f32 %v713_v55 }
 0x3a3   : > { %v824_v56 = vpop.xlane.xlu1 %823 }
 0x3a4   : > { %1401 = vrcp.f32 %v824_v56 }
 0x3a7   : > { %v939_v1 = vpop.permute.xlu1 %938 }
 0x3a8   : > { %v944_v3 = vsel %vm609_vm3, %v939_v1, 0 }
 0x3a9   : > { %v1400_v57 = vpop.eup %1399 }
 0x3aa   : > { %v715_v58 = vmul.f32 %v1400_v57, %v1392_v41 }
 0x3ab   : > { %v934_v53 = vpop.xlane.xlu0 %933 }
 0x3ac   : > { %1403 = vrcp.f32 %v934_v53  ;;  %v716_v59 = vpack.c.bf16 %v715_v58, %v715_v58 }
 0x3ae   : > { %1259 = vmatmul.mubr.msk.bf16.vlgmr.msra.gmra.mxu1 %vm547_vm2, %v716_v59 }
 0x3af   : > { %v829_v60 = vpop.permute.xlu0 %828  ;;  %1270 = vmatprep.mubr.msk.bf16.mxu1 %vm1608_vm0, %v1607_v0 }
 0x3b0   : > { %v834_v61 = vsel %vm609_vm3, %v829_v60, 0 }
 0x3b1   : > { %v1402_v62 = vpop.eup %1401  ;;  %1269 = vmatpush3.bf16.msra.mxu1 %v834_v61 }
 0x3b2   : > { %1280 = vmatprep.subr.bf16.mxu1 %v1607_v0  ;;  %v826_v63 = vmul.f32 %v1402_v62, %v1394_v44 }
 0x3b4   : > { %v827_v2 = vpack.c.bf16 %v826_v63, %v826_v63 }
 0x3b6   : > { %1271 = vmatmul.mubr.msk.bf16.vlgmr.msra.gmra.mxu1 %vm547_vm2, %v827_v2 }
 0x3b7   : > { %1281 = vmatpush3.bf16.msra.mxu1 %v944_v3  ;;  %1282 = vmatprep.mubr.msk.bf16.mxu1 %vm1608_vm0, %v1607_v0 }
 0x3b9   : > { %v1404_v4 = vpop.eup %1403 }
 0x3ba   : > { %v936_v5 = vmul.f32 %v1404_v4, %v1396_v46 }
 0x3bc   : > { %v937_v6 = vpack.c.bf16 %v936_v5, %v936_v5 }
 0x3be   : > { %1283 = vmatmul.mubr.msk.bf16.vlgmr.msra.gmra.mxu1 %vm547_vm2, %v937_v6 }
 0x3fc   : > { %v647_v7 = vpop.f32.mrf.mxu1 }
 0x3fe   : > { %v1248_v8 = vpop.f32.mrf.mxu1 }
 0x400   : > { %v650_v9 = vpop.f32.mrf.mxu1 }
 0x402   : > { %v1249_v10 = vpop.f32.mrf.mxu1 }
 0x46e   : > { %v760_v11 = vpop.f32.mrf.mxu1 }
 0x46f   : > { %987 = vrot.lane.b32.xlu1 %v760_v11, %s1612_s28 }
 0x470   : > { %v1260_v12 = vpop.f32.mrf.mxu1 }
 0x472   : > { %v763_v13 = vpop.f32.mrf.mxu1 }
 0x474   : > { %v1261_v14 = vpop.f32.mrf.mxu1 }
 0x476   : > { %v870_v15 = vpop.f32.mrf.mxu1 }
 0x477   : > { %991 = vrot.lane.b32.xlu0 %v870_v15, %s1613_s14 }
 0x478   : > { %v1272_v0 = vpop.f32.mrf.mxu1 }
 0x47a   : > { %v873_v16 = vpop.f32.mrf.mxu1 }
 0x47c   : > { %v1273_v17 = vpop.f32.mrf.mxu1 }
 0x47e   : > { %v980_v18 = vpop.f32.mrf.mxu1 }
 0x47f   : > { %995 = vrot.lane.b32.xlu1 %v980_v18, %s1614_s18 }
 0x480   : > { %v1284_v19 = vpop.f32.mrf.mxu1 }
 0x482   : > { %v983_v20 = vpop.f32.mrf.mxu1 }
 0x484   : > { %v1285_v21 = vpop.f32.mrf.mxu1 }
 0x4e1   : > { %v988_v22 = vpop.permute.xlu1 %987 }
 0x4e2   : > { %v998_v24 = vsel %vm547_vm2, %v647_v7, %v988_v22 }
 0x4e9   : > { %v992_v23 = vpop.permute.xlu0 %991 }
 0x4ea   : > { %v1000_v25 = vsel %vm999_vm4, %v998_v24, %v992_v23 }
 0x4f1   : > { %v996_v26 = vpop.permute.xlu1 %995 }
 0x4f2   : > { %v1002_v27 = vsel %vm1001_vm5, %v1000_v25, %v996_v26 }
 0x4f3   : > { %1003 = vst.msk [vmem:[%s348_s2] sm:$0xff] %vm372_vm1, %v1002_v27 }
 0x4f4   : > { %1524 = shalt.err (!%p1521_p1)
}
 0x4f5   : > { %s1525_s15 = scalar_lea.hbm %s1901_s9, 128  ;;  %s1529_s28 = scalar_lea.hbm %s1950_s6, 256 }
 0x4f6   : > { %p1526_p4 = scmp.ne.s32.totalorder %s1901_s9, %s1525_s15  ;;  %p1530_p5 = scmp.lt.s32.totalorder %s1901_s9, %s1950_s6 }
 0x4f7   : > { %p1531_p3 = scmp.lt.s32.totalorder %s1529_s28, %s1525_s15 }
 0x4f8   : > { %p1527_p8 = pnand %p1526_p4, %p1751_p0 }
 0x4f9   : > { %p1532_p10 = por %p1531_p3, %p1530_p5 }
 0x4fa   : > { %p1528_p12 = pneg %p1527_p8 }
 0x4fc   : > { %p1533_p2 = pnand %p1532_p10, %p1528_p12 }
 0x4fe   : > { %1536 = shalt.err (!%p1533_p2)
}
 0x4ff   : > { %1300 = dma.vmem_to_hbm [thread:$0]  (%p1751_p0), %s1020_s1, 128, %s1901_s9, %s1005_s13  }
 0x500 PF: > { %s1031_s10 = sand.u32 1, %s1579_s21   ;;  %p1970_p11 = scmp.ne.s32.totalorder %s1960_s8, 0 }
 0x501   : > { %p1971_p7 = scmp.ge.s32.totalorder %s1599_s26, 2  ;;  %s1032_s2 = scalar_lea.sflag [#allocation4], %s1031_s10 }
 0x503   : > { %p1317_p6 = pnand %p1971_p7, %p1970_p11 }
 0x505   : > { %p1318_p9 = pneg %p1317_p6 }
 0x507   : > { %1574 = dma.done.wait (%p1318_p9), %s1032_s2, 128  }
 0x508   : > { %1576 = vsyncadd (%p1318_p9), %s1032_s2, 4294967168  ;;  %s24_s26 = sadd.s32 1, %s1599_s26   ;;  %s1972_s21 = smov %s1583_s22 }
 0x509   : > { %p21_p13 = scmp.ge.s32.totalorder %s24_s26, 4   ;;  %s1973_s22 = smov %s1587_s23 }
 0x50a   : > { %s1974_s23 = smov %s1763_s19  ;;  %s1975_s24 = smov %s1595_s25 }
 0x50b   : > { %s1976_s25 = smov %s1978_s20  ;;  %23 = sbr.rel (!%p21_p13) target bundleno = 11 (0xb), region = 110 }
 0x510   :  { %1037 = vsyncpa [#allocation3], 1 }
 0x511   :  { %1039 = vsyncpa [#allocation3 + $0x1], 1 }
 0x512   :  { %1040 = vsyncpa [#allocation6], 1 }
 0x513   :  { %1041 = vsyncpa [#allocation9], 1 }
 0x514   :  { %1042 = vsyncpa [#allocation4], 1 }
 0x515   :  { %1044 = vsyncpa [#allocation4 + $0x1], 1 }

</bundles_post_ra>
